<compile_context>
chip_gen: v6e
topology: v6e:2x2x1
jax: 0.10.0
libtpu: 0.0.40
codegen_flags: <defaults>
</compile_context>

<pallas_src>
import functools
import math
import numpy as np
import jax
import jax.numpy as jnp
from jax.experimental import pallas as pl
from jax.experimental.pallas import tpu as pltpu


# ----------------------------------------------------------------------------
# helpers
# ----------------------------------------------------------------------------
def _pick_tile(n, candidates):
    """Largest candidate tile that evenly divides n, else the full extent."""
    for c in candidates:
        if n >= c and n % c == 0:
            return c
    return n


_VMEM_LIMIT = None


def _vmem_limit_bytes():
    """~75% of physical VMEM (96 MiB on v5e/v6e, 48 MiB on v7x), capped at 100 MiB."""
    global _VMEM_LIMIT
    if _VMEM_LIMIT is None:
        limit = 32 * 1024 * 1024
        try:
            cap = pltpu.get_tpu_info().vmem_capacity_bytes
            limit = min(int(cap) * 3 // 4, 100 * 1024 * 1024)
        except Exception:
            pass
        _VMEM_LIMIT = limit
    return _VMEM_LIMIT


def _cparams(*semantics):
    return pltpu.CompilerParams(
        dimension_semantics=semantics,
        vmem_limit_bytes=_vmem_limit_bytes(),
    )


def _bf16(x):
    """Cast to bf16 only if needed (weights are already stored in bf16)."""
    return x if x.dtype == jnp.bfloat16 else x.astype(jnp.bfloat16)


# ----------------------------------------------------------------------------
# Pallas kernels
# ----------------------------------------------------------------------------
def _matmul_bias_kernel(x_ref, w_ref, b_ref, o_ref, acc_ref):
    # grid = (M tiles, N tiles, K tiles); accumulate over K; bias at last K step.
    @pl.when(pl.program_id(2) == 0)
    def _():
        acc_ref[...] = jnp.zeros_like(acc_ref)

    acc_ref[...] += jnp.dot(
        _bf16(x_ref[...]), _bf16(w_ref[...]),
        preferred_element_type=jnp.float32,
    )

    @pl.when(pl.program_id(2) == pl.num_programs(2) - 1)
    def _():
        o_ref[...] = (acc_ref[...] + b_ref[...]).astype(o_ref.dtype)


def _matmul_add_ln_kernel(x_ref, w_ref, b_ref, r_ref, g_ref, bt_ref, o_ref, acc_ref):
    # fused: (x @ w + b) + residual -> LayerNorm (eps=1e-5, biased variance)
    # grid = (M tiles, K tiles); LN needs the full feature row, so N is untiled.
    @pl.when(pl.program_id(1) == 0)
    def _():
        acc_ref[...] = jnp.zeros_like(acc_ref)

    acc_ref[...] += jnp.dot(
        _bf16(x_ref[...]), _bf16(w_ref[...]),
        preferred_element_type=jnp.float32,
    )

    @pl.when(pl.program_id(1) == pl.num_programs(1) - 1)
    def _():
        y = acc_ref[...] + b_ref[...] + r_ref[...].astype(jnp.float32)
        mu = jnp.mean(y, axis=-1, keepdims=True)
        var = jnp.mean((y - mu) ** 2, axis=-1, keepdims=True)
        o_ref[...] = ((y - mu) * jax.lax.rsqrt(var + 1e-5)
                      * g_ref[...] + bt_ref[...]).astype(o_ref.dtype)


def _ffn_add_ln_kernel(x_ref, w1_ref, b1_ref, w2_ref, b2_ref,
                       r_ref, g_ref, bt_ref, o_ref, acc_ref):
    # fused position-wise FFN + residual + LayerNorm, tiled over the d_ff axis:
    #   acc += ReLU(x @ w1_f + b1_f) @ w2_f;  finalize: + b2 + residual -> LN
    @pl.when(pl.program_id(1) == 0)
    def _():
        acc_ref[...] = jnp.zeros_like(acc_ref)

    xb = _bf16(x_ref[...])
    h = jnp.dot(xb, _bf16(w1_ref[...]),
                preferred_element_type=jnp.float32) + b1_ref[...]
    h = jnp.maximum(h, 0.0)
    acc_ref[...] += jnp.dot(h.astype(jnp.bfloat16), _bf16(w2_ref[...]),
                            preferred_element_type=jnp.float32)

    @pl.when(pl.program_id(1) == pl.num_programs(1) - 1)
    def _():
        y = acc_ref[...] + b2_ref[...] + r_ref[...].astype(jnp.float32)
        mu = jnp.mean(y, axis=-1, keepdims=True)
        var = jnp.mean((y - mu) ** 2, axis=-1, keepdims=True)
        o_ref[...] = ((y - mu) * jax.lax.rsqrt(var + 1e-5)
                      * g_ref[...] + bt_ref[...]).astype(o_ref.dtype)


def _attention_kernel(q_ref, k_ref, v_ref, pad_ref, ctx_ref, attn_ref, *,
                      scale, causal):
    # One grid step per (batch, head, q-tile).
    #   q: (1, 1, tq, d_k)   k: (1, 1, Tk, d_k)   v: (1, 1, Tk, d_v)
    #   pad: (1, 1, Tk) int32 key-padding mask; causal triangle built in-kernel.
    tq = q_ref.shape[2]
    Tk = k_ref.shape[2]

    q = _bf16(q_ref[0, 0])          # (tq, d_k)
    k = _bf16(k_ref[0, 0])          # (Tk, d_k)
    v = _bf16(v_ref[0, 0])          # (Tk, d_v)

    scores = jax.lax.dot_general(
        q, k, (((1,), (1,)), ((), ())),
        preferred_element_type=jnp.float32) * scale       # (tq, Tk) f32

    mask = jnp.broadcast_to(pad_ref[0] != 0, (tq, Tk))    # key padding
    if causal:
        q0 = pl.program_id(2) * tq
        row = q0 + jax.lax.broadcasted_iota(jnp.int32, (tq, Tk), 0)
        col = jax.lax.broadcasted_iota(jnp.int32, (tq, Tk), 1)
        mask = mask | (col > row)

    scores = jnp.where(mask, jnp.float32(-1e9), scores)

    m = jnp.max(scores, axis=-1, keepdims=True)
    e = jnp.exp(scores - m)                                # f32 softmax math
    attn = e / jnp.sum(e, axis=-1, keepdims=True)          # exact normalization

    attn_ref[0, 0] = attn
    ctx_ref[0, 0] = jnp.dot(attn.astype(jnp.bfloat16), v,
                            preferred_element_type=jnp.float32
                            ).astype(ctx_ref.dtype)


# ----------------------------------------------------------------------------
# Pallas wrappers
# ----------------------------------------------------------------------------
def fused_linear(x2d, w, b, out_dtype=jnp.bfloat16):
    M, K = x2d.shape
    N = w.shape[1]
    tm = _pick_tile(M, (256, 128))
    tn = _pick_tile(N, (512, 256, 128))
    tk = _pick_tile(K, (512, 256))
    return pl.pallas_call(
        _matmul_bias_kernel,
        grid=(M // tm, N // tn, K // tk),
        in_specs=[
            pl.BlockSpec((tm, tk), lambda i, j, k: (i, k)),
            pl.BlockSpec((tk, tn), lambda i, j, k: (k, j)),
            pl.BlockSpec((1, tn), lambda i, j, k: (0, j)),
        ],
        out_specs=pl.BlockSpec((tm, tn), lambda i, j, k: (i, j)),
        out_shape=jax.ShapeDtypeStruct((M, N), out_dtype),
        scratch_shapes=[pltpu.VMEM((tm, tn), jnp.float32)],
        compiler_params=_cparams("parallel", "parallel", "arbitrary"),
    )(x2d, w, b.reshape(1, N))


def matmul_add_layernorm(x2d, w, b, residual2d, gamma, beta):
    M, K = x2d.shape
    D = w.shape[1]
    tm = _pick_tile(M, (256, 128))
    tk = _pick_tile(K, (512, 256))
    return pl.pallas_call(
        _matmul_add_ln_kernel,
        grid=(M // tm, K // tk),
        in_specs=[
            pl.BlockSpec((tm, tk), lambda i, k: (i, k)),
            pl.BlockSpec((tk, D), lambda i, k: (k, 0)),
            pl.BlockSpec((1, D), lambda i, k: (0, 0)),
            pl.BlockSpec((tm, D), lambda i, k: (i, 0)),
            pl.BlockSpec((1, D), lambda i, k: (0, 0)),
            pl.BlockSpec((1, D), lambda i, k: (0, 0)),
        ],
        out_specs=pl.BlockSpec((tm, D), lambda i, k: (i, 0)),
        out_shape=jax.ShapeDtypeStruct((M, D), jnp.float32),
        scratch_shapes=[pltpu.VMEM((tm, D), jnp.float32)],
        compiler_params=_cparams("parallel", "arbitrary"),
    )(x2d, w, b.reshape(1, D), residual2d, gamma.reshape(1, D), beta.reshape(1, D))


def ffn_add_layernorm(x2d, w1, b1, w2, b2, residual2d, gamma, beta):
    M, D = x2d.shape
    F = w1.shape[1]
    tm = _pick_tile(M, (256, 128))
    tf = _pick_tile(F, (512, 256))
    return pl.pallas_call(
        _ffn_add_ln_kernel,
        grid=(M // tm, F // tf),
        in_specs=[
            pl.BlockSpec((tm, D), lambda i, f: (i, 0)),
            pl.BlockSpec((D, tf), lambda i, f: (0, f)),
            pl.BlockSpec((1, tf), lambda i, f: (0, f)),
            pl.BlockSpec((tf, D), lambda i, f: (f, 0)),
            pl.BlockSpec((1, D), lambda i, f: (0, 0)),
            pl.BlockSpec((tm, D), lambda i, f: (i, 0)),
            pl.BlockSpec((1, D), lambda i, f: (0, 0)),
            pl.BlockSpec((1, D), lambda i, f: (0, 0)),
        ],
        out_specs=pl.BlockSpec((tm, D), lambda i, f: (i, 0)),
        out_shape=jax.ShapeDtypeStruct((M, D), jnp.float32),
        scratch_shapes=[pltpu.VMEM((tm, D), jnp.float32)],
        compiler_params=_cparams("parallel", "arbitrary"),
    )(x2d, w1, b1.reshape(1, F), w2, b2.reshape(1, D),
      residual2d, gamma.reshape(1, D), beta.reshape(1, D))


def attention(q, k, v, pad_key_mask, causal):
    # q: (B, H, Tq, d_k)  k: (B, H, Tk, d_k)  v: (B, H, Tk, d_v)
    # pad_key_mask: (B, 1, Tk) int32 (nonzero == padding key)
    B, H, Tq, d_k = q.shape
    Tk = k.shape[2]
    d_v = v.shape[3]
    tq = _pick_tile(Tq, (256, 128))
    # TODO(synk): for very long Tk, add Tk tiling with online softmax.
    kernel = functools.partial(
        _attention_kernel, scale=1.0 / math.sqrt(d_k), causal=causal)
    ctx, attn = pl.pallas_call(
        kernel,
        grid=(B, H, Tq // tq),
        in_specs=[
            pl.BlockSpec((1, 1, tq, d_k), lambda b, h, qi: (b, h, qi, 0)),
            pl.BlockSpec((1, 1, Tk, d_k), lambda b, h, qi: (b, h, 0, 0)),
            pl.BlockSpec((1, 1, Tk, d_v), lambda b, h, qi: (b, h, 0, 0)),
            pl.BlockSpec((1, 1, Tk), lambda b, h, qi: (b, 0, 0)),
        ],
        out_specs=[
            pl.BlockSpec((1, 1, tq, d_v), lambda b, h, qi: (b, h, qi, 0)),
            pl.BlockSpec((1, 1, tq, Tk), lambda b, h, qi: (b, h, qi, 0)),
        ],
        out_shape=[
            jax.ShapeDtypeStruct((B, H, Tq, d_v), jnp.bfloat16),
            jax.ShapeDtypeStruct((B, H, Tq, Tk), jnp.float32),
        ],
        compiler_params=_cparams("parallel", "parallel", "parallel"),
    )(q, k, v, pad_key_mask)
    return ctx, attn


# ----------------------------------------------------------------------------
# Model pieces (plain-JAX glue + Pallas compute)
# ----------------------------------------------------------------------------
def get_sincos_encoding(n_position, d_model):
    pos = np.arange(n_position)[:, None].astype(np.float64)
    i = np.arange(d_model)[None, :]
    angle = pos / np.power(10000.0, 2 * (i // 2) / d_model)
    table = np.zeros((n_position, d_model), dtype=np.float32)
    table[:, 0::2] = np.sin(angle[:, 0::2])
    table[:, 1::2] = np.cos(angle[:, 1::2])
    return jnp.asarray(table, dtype=jnp.float32)


def _split_heads(x2d, B, T, n_heads, d_head):
    # TODO(synk): head split kept as XLA reshape/transpose; BlockSpec last-dim
    # selection at d_head (<128) granularity would violate the lane-tile rule.
    return x2d.reshape(B, T, n_heads, d_head).transpose(0, 2, 1, 3)


def self_attention_block(x, pad_mask, p, d_k, d_v, n_heads):
    B, T, d_model = x.shape
    hk = n_heads * d_k
    hv = n_heads * d_v
    x2 = x.reshape(B * T, d_model)

    qkv = fused_linear(x2, p["wqkv"], p["bqkv"])            # (B*T, 2*hk+hv) bf16
    q = _split_heads(qkv[:, :hk], B, T, n_heads, d_k)       # (B, H, T, d_k)
    k = _split_heads(qkv[:, hk:2 * hk], B, T, n_heads, d_k)
    v = _split_heads(qkv[:, 2 * hk:], B, T, n_heads, d_v)

    ctx, attn = attention(q, k, v, pad_mask, causal=True)   # ctx: (B, H, T, d_v)
    ctx2 = ctx.transpose(0, 2, 1, 3).reshape(B * T, hv)
    out = matmul_add_layernorm(ctx2, p["wo"], p["bo"],
                               x2, p["ln_g"], p["ln_b"])
    return out.reshape(B, T, d_model), attn


def cross_attention_block(q_in, kv_in, pad_mask, p, d_k, d_v, n_heads):
    B, Tq, d_model = q_in.shape
    Tk = kv_in.shape[1]
    hk = n_heads * d_k
    hv = n_heads * d_v
    q2 = q_in.reshape(B * Tq, d_model)

    q = _split_heads(fused_linear(q2, p["wq"], p["bq"]), B, Tq, n_heads, d_k)
    kv = fused_linear(kv_in.reshape(B * Tk, d_model), p["wkv"], p["bkv"])
    k = _split_heads(kv[:, :hk], B, Tk, n_heads, d_k)
    v = _split_heads(kv[:, hk:], B, Tk, n_heads, d_v)

    ctx, attn = attention(q, k, v, pad_mask, causal=False)
    ctx2 = ctx.transpose(0, 2, 1, 3).reshape(B * Tq, hv)
    out = matmul_add_layernorm(ctx2, p["wo"], p["bo"],
                               q2, p["ln_g"], p["ln_b"])
    return out.reshape(B, Tq, d_model), attn


def feed_forward(x, p):
    B, T, D = x.shape
    x2 = x.reshape(B * T, D)
    out = ffn_add_layernorm(x2, p["w1"], p["b1"], p["w2"], p["b2"],
                            x2, p["ln_g"], p["ln_b"])
    return out.reshape(B, T, D)


def decoder_layer(dec_in, enc_out, self_pad, cross_pad, lp, d_K, d_V, n_heads):
    out, self_attn = self_attention_block(dec_in, self_pad, lp["self_attn"],
                                          d_K, d_V, n_heads)
    out, cross_attn = cross_attention_block(out, enc_out, cross_pad,
                                            lp["cross_attn"], d_K, d_V, n_heads)
    out = feed_forward(out, lp["ffn"])
    return out, self_attn, cross_attn


def decoder_forward(params, decoder_inputs, encoder_inputs, encoder_outputs,
                    d_K, d_V, n_heads):
    B, tgt_len = decoder_inputs.shape

    # target embedding + frozen sinusoidal position embedding of positions 0..T-1
    # TODO(synk): embedding gather stays in plain JAX (no clean Pallas gather here).
    tok = jnp.take(params["tgt_emb"], decoder_inputs, axis=0)      # (B, T, d_model)
    pos = params["pos_emb"][:tgt_len][None, :, :]                  # (1, T, d_model)
    dec_out = tok + pos

    # Only key-padding vectors are passed to the kernels; the causal
    # (subsequent) mask is generated in-kernel via broadcasted_iota.
    self_pad = (decoder_inputs == 0).astype(jnp.int32)[:, None, :]   # (B,1,T)
    cross_pad = (encoder_inputs == 0).astype(jnp.int32)[:, None, :]  # (B,1,S)

    self_attns, cross_attns = [], []
    for lp in params["layers"]:
        dec_out, sa, ca = decoder_layer(
            dec_out, encoder_outputs, self_pad, cross_pad, lp, d_K, d_V, n_heads
        )
        self_attns.append(sa)
        cross_attns.append(ca)
    return dec_out, self_attns, cross_attns


# ----------------------------------------------------------------------------
# Deterministic parameter initialization (fused QKV / KV projection weights,
# weights stored in bf16; biases / LayerNorm / embeddings in f32)
# ----------------------------------------------------------------------------
def init_params(key, tgt_vocab, tgt_len, d_model, d_ff, d_K, d_V, n_heads, n_layers):
    def nrm(k, shape, scale=0.02):
        return (scale * jax.random.normal(k, shape)).astype(jnp.float32)

    def wnrm(k, shape, scale=0.02):
        return nrm(k, shape, scale).astype(jnp.bfloat16)

    hk, hv = n_heads * d_K, n_heads * d_V
    keys = jax.random.split(key, 1 + n_layers)
    params = {
        "tgt_emb": nrm(keys[0], (tgt_vocab, d_model), 1.0),
        "pos_emb": get_sincos_encoding(tgt_len + 1, d_model),
        "layers": [],
    }
    for li in range(n_layers):
        lk = jax.random.split(keys[1 + li], 8)
        self_attn = {
            "wqkv": wnrm(lk[0], (d_model, 2 * hk + hv)),
            "bqkv": jnp.zeros((2 * hk + hv,), jnp.float32),
            "wo": wnrm(lk[1], (hv, d_model)),
            "bo": jnp.zeros((d_model,), jnp.float32),
            "ln_g": jnp.ones((d_model,), jnp.float32),
            "ln_b": jnp.zeros((d_model,), jnp.float32),
        }
        cross_attn = {
            "wq": wnrm(lk[2], (d_model, hk)),
            "bq": jnp.zeros((hk,), jnp.float32),
            "wkv": wnrm(lk[3], (d_model, hk + hv)),
            "bkv": jnp.zeros((hk + hv,), jnp.float32),
            "wo": wnrm(lk[4], (hv, d_model)),
            "bo": jnp.zeros((d_model,), jnp.float32),
            "ln_g": jnp.ones((d_model,), jnp.float32),
            "ln_b": jnp.zeros((d_model,), jnp.float32),
        }
        ffn_p = {
            "w1": wnrm(lk[5], (d_model, d_ff)),
            "b1": jnp.zeros((d_ff,), jnp.float32),
            "w2": wnrm(lk[6], (d_ff, d_model)),
            "b2": jnp.zeros((d_model,), jnp.float32),
            "ln_g": jnp.ones((d_model,), jnp.float32),
            "ln_b": jnp.zeros((d_model,), jnp.float32),
        }
        params["layers"].append({"self_attn": self_attn,
                                 "cross_attn": cross_attn,
                                 "ffn": ffn_p})
    return params


# ----------------------------------------------------------------------------
if __name__ == "__main__":
    # small, decoder-consistent shapes
    B = 2
    tgt_vocab = 16
    tgt_len = 8
    src_len = 8
    d_model = 32
    d_ff = 64
    d_K = d_V = 8
    n_heads = 4
    n_layers = 2

    root = jax.random.PRNGKey(0)
    k_param, k_dec, k_enc, k_encout = jax.random.split(root, 4)

    params = init_params(k_param, tgt_vocab, tgt_len, d_model, d_ff,
                         d_K, d_V, n_heads, n_layers)

    decoder_inputs = jax.random.randint(k_dec, (B, tgt_len), 0, tgt_vocab, dtype=jnp.int32)
    encoder_inputs = jax.random.randint(k_enc, (B, src_len), 0, tgt_vocab, dtype=jnp.int32)
    encoder_outputs = jax.random.normal(k_encout, (B, src_len, d_model), dtype=jnp.float32)

    dec_out, self_attns, cross_attns = decoder_forward(
        params, decoder_inputs, encoder_inputs, encoder_outputs, d_K, d_V, n_heads
    )

    jax.block_until_ready(dec_out)
    for a in self_attns + cross_attns:
        jax.block_until_ready(a)

    assert dec_out.shape == (B, tgt_len, d_model)
    assert dec_out.dtype == jnp.float32
    assert len(self_attns) == n_layers and len(cross_attns) == n_layers
    assert self_attns[0].shape == (B, n_heads, tgt_len, tgt_len)
    assert cross_attns[0].shape == (B, n_heads, tgt_len, src_len)
    assert bool(jnp.all(jnp.isfinite(dec_out)))
    print("KERNEL_OK")
</pallas_src>

<mosaic_0001>
module attributes {stable_mosaic.version = 11 : i64} {
  func.func @_matmul_bias_kernel(%arg0: i32, %arg1: i32, %arg2: i32, %arg3: memref<16x32xf32, #tpu.memory_space<vmem>>, %arg4: memref<32x96xbf16, #tpu.memory_space<vmem>>, %arg5: memref<1x96xf32, #tpu.memory_space<vmem>>, %arg6: memref<16x96xbf16, #tpu.memory_space<vmem>>, %arg7: memref<16x96xf32, #tpu.memory_space<vmem>>) attributes {dimension_semantics = [#tpu.dimension_semantics<parallel>, #tpu.dimension_semantics<parallel>, #tpu.dimension_semantics<arbitrary>], iteration_bounds = array<i64: 1, 1, 1>, scalar_prefetch = 0 : i64, scratch_operands = 1 : i64, tpu.core_type = #tpu.core_type<tc>, window_params = [{transform_indices = @transform_0, window_bounds = array<i64: 16, 32>}, {transform_indices = @transform_1, window_bounds = array<i64: 32, 96>}, {transform_indices = @transform_2, window_bounds = array<i64: 1, 96>}, {transform_indices = @transform_3, window_bounds = array<i64: 16, 96>}]} {
    %c0_i32 = arith.constant 0 : i32
    %0 = arith.cmpi eq, %arg2, %c0_i32 : i32
    %1 = arith.extui %0 : i1 to i32
    %c0_i32_0 = arith.constant 0 : i32
    %2 = arith.cmpi ne, %1, %c0_i32_0 : i32
    scf.if %2 {
      %cst_10 = arith.constant 0.000000e+00 : f32
      %13 = vector.broadcast %cst_10 : f32 to vector<16x96xf32>
      %c0_11 = arith.constant 0 : index
      %c0_12 = arith.constant 0 : index
      %14 = vector.load %arg7[%c0_11, %c0_12] : memref<16x96xf32, #tpu.memory_space<vmem>>, vector<16x96xf32>
      tpu.vector_store %arg7[%c0_11, %c0_12], %13 {strides = array<i32>} : memref<16x96xf32, #tpu.memory_space<vmem>>, vector<16x96xf32>,
    } else {
    }
    %c0 = arith.constant 0 : index
    %c0_1 = arith.constant 0 : index
    %3 = vector.load %arg7[%c0, %c0_1] : memref<16x96xf32, #tpu.memory_space<vmem>>, vector<16x96xf32>
    %c0_2 = arith.constant 0 : index
    %c0_3 = arith.constant 0 : index
    %4 = vector.load %arg3[%c0_2, %c0_3] : memref<16x32xf32, #tpu.memory_space<vmem>>, vector<16x32xf32>
    %5 = arith.truncf %4 : vector<16x32xf32> to vector<16x32xbf16>
    %c0_4 = arith.constant 0 : index
    %c0_5 = arith.constant 0 : index
    %6 = vector.load %arg4[%c0_4, %c0_5] : memref<32x96xbf16, #tpu.memory_space<vmem>>, vector<32x96xbf16>
    %cst = arith.constant dense<0.000000e+00> : vector<16x96xf32>
    %7 = tpu.matmul %5, %6, %cst {dimension_numbers = #tpu.dot_dimension_numbers<[1], [0], [0], [1], [0, 0, 1, 1], [], []>} : vector<16x32xbf16>, vector<32x96xbf16>, vector<16x96xf32> -> vector<16x96xf32>
    %8 = arith.addf %3, %7 : vector<16x96xf32>
    %c0_6 = arith.constant 0 : index
    %c0_7 = arith.constant 0 : index
    %9 = vector.load %arg7[%c0_6, %c0_7] : memref<16x96xf32, #tpu.memory_space<vmem>>, vector<16x96xf32>
    tpu.vector_store %arg7[%c0_6, %c0_7], %8 {strides = array<i32>} : memref<16x96xf32, #tpu.memory_space<vmem>>, vector<16x96xf32>,
    %c0_i32_8 = arith.constant 0 : i32
    %10 = arith.cmpi eq, %arg2, %c0_i32_8 : i32
    %11 = arith.extui %10 : i1 to i32
    %c0_i32_9 = arith.constant 0 : i32
    %12 = arith.cmpi ne, %11, %c0_i32_9 : i32
    scf.if %12 {
      %c0_10 = arith.constant 0 : index
      %c0_11 = arith.constant 0 : index
      %13 = vector.load %arg7[%c0_10, %c0_11] : memref<16x96xf32, #tpu.memory_space<vmem>>, vector<16x96xf32>
      %c0_12 = arith.constant 0 : index
      %c0_13 = arith.constant 0 : index
      %14 = vector.load %arg5[%c0_12, %c0_13] : memref<1x96xf32, #tpu.memory_space<vmem>>, vector<1x96xf32>
      %15 = vector.broadcast %14 : vector<1x96xf32> to vector<16x96xf32>
      %16 = arith.addf %13, %15 : vector<16x96xf32>
      %17 = arith.truncf %16 : vector<16x96xf32> to vector<16x96xbf16>
      %c0_14 = arith.constant 0 : index
      %c0_15 = arith.constant 0 : index
      %18 = vector.load %arg6[%c0_14, %c0_15] : memref<16x96xbf16, #tpu.memory_space<vmem>>, vector<16x96xbf16>
      tpu.vector_store %arg6[%c0_14, %c0_15], %17 {strides = array<i32>} : memref<16x96xbf16, #tpu.memory_space<vmem>>, vector<16x96xbf16>,
    } else {
    }
    return
  }
  func.func @transform_0(%arg0: i32, %arg1: i32, %arg2: i32) -> (i32, i32) {
    %c0_i32 = arith.constant 0 : i32
    return %arg0, %arg2 : i32, i32
  }
  func.func @transform_1(%arg0: i32, %arg1: i32, %arg2: i32) -> (i32, i32) {
    %c0_i32 = arith.constant 0 : i32
    return %arg2, %arg1 : i32, i32
  }
  func.func @transform_2(%arg0: i32, %arg1: i32, %arg2: i32) -> (i32, i32) {
    %c0_i32 = arith.constant 0 : i32
    %c0_i32_0 = arith.constant 0 : i32
    return %c0_i32, %arg1 : i32, i32
  }
  func.func @transform_3(%arg0: i32, %arg1: i32, %arg2: i32) -> (i32, i32) {
    %c0_i32 = arith.constant 0 : i32
    return %arg0, %arg1 : i32, i32
  }
}

</mosaic_0001>

<bundles_post_ra>
// kernel: tpu_custom_call.1
= control target key start
LH: loop header
LB: loop body
LE: loop exit
PB: predicated region body
PF: predicated region fallthrough
CT: control target
= control target key end

     0   :  { %8 = vsyncpa [#allocation4], 0  ;;  %s312_s0 = inlined_call_operand.hbm [shape: f32[16,32], index: 0, kind: input, shape index: {}]   ;;  %s313_s1 = inlined_call_operand.hbm [shape: bf16[32,96], index: 1, kind: input, shape index: {}]   ;;  %s314_s2 = inlined_call_operand.vmem [shape: f32[1,96], index: 2, kind: input, shape index: {}]   ;;  %s315_s3 = inlined_call_operand.hbm [shape: bf16[16,96], index: 3, kind: output, shape index: {}]  }
   0x1   :  { %9 = vsyncpa [#allocation7], 0 }
   0x2   :  { %10 = vsyncpa [#allocation5], 0  ;;  %s261_s12 = smov [#allocation3]  }
   0x3   :  { %s16_s13 = sshll.u32 %s261_s12, 4  ;;  %s17_s13 = int_to_ptr.vmem [resolvable:$true] %s16_s13 }
   0x4   :  { %s203_s14 = scalar_lea.vmem %s17_s13, 256  ;;  %p208_p1 = scmp.lt.s32.totalorder %s17_s13, %s17_s13 }
   0x5   :  { %p204_p0 = scmp.ne.s32.totalorder %s17_s13, %s203_s14  ;;  %p209_p2 = scmp.lt.s32.totalorder %s203_s14, %s203_s14 }
   0x7   :  { %p210_p3 = por %p209_p2, %p208_p1 }
   0x9   :  { %p211_p4 = pnand %p210_p3, %p204_p0 }
   0xb   :  { %214 = shalt.err (!%p211_p4)
}
   0xc   :  { %s262_s15 = smov 128   ;;  %s263_s16 = smov 8  }
   0xd   :  { %22 = dma.hbm_to_vmem [thread:$0]  %s312_s0, 256, %s17_s13, [#allocation4], %s262_s15, %s262_s15, %s263_s16  }
   0xe   :  { %s264_s19 = smov [#allocation6]  }
   0xf   :  { %s28_s20 = sshll.u32 %s264_s19, 4  ;;  %s29_s20 = int_to_ptr.vmem [resolvable:$true] %s28_s20 }
  0x10   :  { %s223_s21 = scalar_lea.vmem %s29_s20, 256  ;;  %p228_p6 = scmp.lt.s32.totalorder %s29_s20, %s29_s20 }
  0x11   :  { %p224_p5 = scmp.ne.s32.totalorder %s29_s20, %s223_s21  ;;  %p229_p7 = scmp.lt.s32.totalorder %s223_s21, %s223_s21 }
  0x13   :  { %p230_p8 = por %p229_p7, %p228_p6 }
  0x15   :  { %p231_p9 = pnand %p230_p8, %p224_p5 }
  0x17   :  { %234 = shalt.err (!%p231_p9)
}
  0x18   :  { %s265_s22 = smov 64   ;;  %s266_s23 = smov 4  }
  0x19   :  { %34 = dma.hbm_to_vmem [thread:$0]  %s313_s1, 256, %s29_s20, [#allocation7], %s265_s22, %s265_s22, %s266_s23  }
  0x1a   :  { %255 = dma.done.wait [#allocation4], 256  }
  0x1b   :  { %256 = vsyncadd [#allocation4], 4294967040 }
  0x1c   :  { %257 = dma.done.wait [#allocation7], 256  }
  0x1d   :  { %258 = vsyncadd [#allocation7], 4294967040  ;;  %vm48_vm0 = vcmask 785408   ;;  %v267_v0 = vmov 0.0   ;;  %vm268_vm1 = vmmov 0   ;;  %v193_v1 = vld [vmem:[#allocation6 + $0x8] sm:$0xff]  }
  0x1e   :  { %49 = vst.msk [vmem:[#allocation2] sm:$0xff] %vm48_vm0, %v267_v0  ;;  %50 = vst.msk [vmem:[#allocation2 + $0x8] sm:$0xff] %vm48_vm0, %v267_v0  ;;  %176 = vmatprep.subr.bf16.mxu0 %v267_v0  ;;  %180 = vmatprep.mubr.msk.bf16.mxu0 %vm268_vm1, %v267_v0  ;;  %v194_v2 = vld [vmem:[#allocation6] sm:$0xff]   ;;  %v53_v3 = vld [vmem:[#allocation3] sm:$0xff]  ;;  %vm72_vm2 = vcmask 261120   ;;  %vm144_vm3 = vcmask 781312  }
  0x1f   :  { %177 = vmatpush3.bf16.msra.mxu0 %v193_v1  ;;  %v54_v4 = vld [vmem:[#allocation3 + $0x8] sm:$0xff]  ;;  %v168_v14 = vld [vmem:[%s314_s2] ss:$0 sm:$0xff]  ;;  %s269_s26 = smov [#allocation8]  }
  0x20   :  { %178 = vmatprep.subr.bf16.mxu0 %v267_v0  ;;  %v55_v5 = vpack.c.bf16 %v54_v4, %v53_v3  ;;  %s152_s27 = sshll.u32 %s269_s26, 4  ;;  %s153_s27 = int_to_ptr.vmem [resolvable:$true] %s152_s27 }
  0x21   :  { %s235_s28 = scalar_lea.vmem %s153_s27, 128  ;;  %p240_p11 = scmp.lt.s32.totalorder %s153_s27, %s153_s27 }
  0x22   :  { %p236_p10 = scmp.ne.s32.totalorder %s153_s27, %s235_s28  ;;  %p241_p12 = scmp.lt.s32.totalorder %s235_s28, %s235_s28 }
  0x23   :  { %179 = vmatpush3.bf16.msra.mxu0 %v194_v2 }
  0x24   :  { %p242_p13 = por %p241_p12, %p240_p11 }
  0x25   :  { %v51_v6 = vld [vmem:[#allocation2] sm:$0xff]  ;;  %v52_v10 = vld [vmem:[#allocation2 + $0x8] sm:$0xff] }
  0x26   :  { %181 = vmatmul.mubr.msk.bf16.vlgmr.msra.gmra.mxu0 %vm72_vm2, %v55_v5  ;;  %p243_p0 = pnand %p242_p13, %p236_p10 }
  0xe6   :  { %v110_v7 = vpop.f32.mrf.mxu0 }
  0xe7   :  { %v117_v8 = vadd.f32 %v110_v7, %v51_v6 }
  0xe8   :  { %v182_v9 = vpop.f32.mrf.mxu0 }
  0xe9   :  { %120 = vst.msk [vmem:[#allocation2] sm:$0xff] %vm48_vm0, %v117_v8 }
  0xea   :  { %v113_v11 = vpop.f32.mrf.mxu0 }
  0xeb   :  { %v118_v12 = vadd.f32 %v113_v11, %v52_v10 }
  0xec   :  { %v183_v13 = vpop.f32.mrf.mxu0 }
  0xed   :  { %121 = vst.msk [vmem:[#allocation2 + $0x8] sm:$0xff] %vm48_vm0, %v118_v12 }
  0xf0   :  { %v125_v15 = vld [vmem:[#allocation2] sm:$0xff] }
  0xf1   :  { %v134_v16 = vadd.f32 %v168_v14, %v125_v15 }
  0xf3   :  { %v171_v17 = vpack.c.bf16 %v134_v16, %v134_v16 }
  0xf4   :  { %v126_v18 = vld [vmem:[#allocation2 + $0x8] sm:$0xff] }
  0xf5   :  { %v135_v19 = vadd.f32 %v168_v14, %v126_v18  ;;  %145 = vst.msk [vmem:[#allocation8] sm:$0xf] %vm144_vm3, %v171_v17 }
  0xf7   :  { %v172_v20 = vpack.c.bf16 %v135_v19, %v135_v19 }
  0xf9   :  { %146 = vst.msk [vmem:[#allocation8 + $0x4] sm:$0xf] %vm144_vm3, %v172_v20 }
  0xfa   :  { %246 = shalt.err (!%p243_p0)
}
  0xfb   :  { %158 = dma.vmem_to_hbm [thread:$0]  %s153_s27, 128, %s315_s3, [#allocation5], %s265_s22, %s265_s22, %s266_s23  }
  0xfc   :  { %259 = dma.done.wait [#allocation5], 128  }
  0xfd   :  { %260 = vsyncadd [#allocation5], 4294967168 }
  0xfe   :  { %162 = vsyncpa [#allocation4], 1 }
  0xff   :  { %163 = vsyncpa [#allocation7], 1 }
 0x100   :  { %164 = vsyncpa [#allocation5], 1 }

</bundles_post_ra>
